<compile_context>
chip_gen: v5e
topology: v5e:2x2
jax: 0.10.0
libtpu: 0.0.40
codegen_flags: <defaults>
</compile_context>

<pallas_src>
import functools

import jax
import jax.numpy as jnp
from jax.experimental import pallas as pl
from jax.experimental.pallas import tpu as pltpu


def _make_kernel(E, H, C):
    """Kernel body; all parameter views are static slices of one packed slab."""

    def kernel(x_ref, p_ref, o_ref):
        x = x_ref[...]                              # (B, E)

        w1t = p_ref[0:E, 0:H]                       # (E, H)   fc1 weight, pre-transposed
        w2t = p_ref[E:E + H, 0:C]                   # (H, C)   fc2 weight, pre-transposed
        b1 = p_ref[E + H:E + H + 1, 0:H]            # (1, H)
        b2 = p_ref[E + H + 1:E + H + 2, 0:C]        # (1, C)

        # fc1: (B,E) @ (E,H) -> (B,H), native MXU contraction (no transpose).
        h = jax.lax.dot_general(
            x, w1t, (((1,), (0,)), ((), ())),
            preferred_element_type=jnp.float32,
        )
        h = jax.nn.sigmoid(h + b1)

        # fc2: (B,H) @ (H,C) -> (B,C).
        logits = jax.lax.dot_general(
            h, w2t, (((1,), (0,)), ((), ())),
            preferred_element_type=jnp.float32,
        )
        logits = logits + b2

        # softmax over dim=0 (batch axis), exactly as F.softmax(..., dim=0).
        m = jnp.max(logits, axis=0, keepdims=True)
        e = jnp.exp(logits - m)
        denom = jnp.sum(e, axis=0, keepdims=True)

        # Approx reciprocal on the EUP + one Newton step (full f32 accuracy;
        # denom >= 1 per column after max-subtraction).
        inv = pl.reciprocal(denom, approx=True)
        inv = inv * (2.0 - denom * inv)

        o_ref[...] = (e * inv).astype(o_ref.dtype)

    return kernel


def pack_params(w1, b1, w2, b2):
    """One-time parameter transform (hoist out of the hot path).

    Layout (f32, W = max(H, C) lanes):
        rows 0      .. E-1      : w1^T  (E, H)  zero-padded to W lanes
        rows E      .. E+H-1    : w2^T  (H, C)  zero-padded to W lanes
        row  E+H                : b1    (H,)    zero-padded to W lanes
        row  E+H+1              : b2    (C,)    zero-padded to W lanes
    """
    H, E = w1.shape
    C, H2 = w2.shape
    assert H2 == H
    W = max(H, C)
    w1t = jnp.pad(w1.T.astype(jnp.float32), ((0, 0), (0, W - H)))    # (E, W)
    w2t = jnp.pad(w2.T.astype(jnp.float32), ((0, 0), (0, W - C)))    # (H, W)
    b1r = jnp.pad(b1.astype(jnp.float32), (0, W - H))[None, :]       # (1, W)
    b2r = jnp.pad(b2.astype(jnp.float32), (0, W - C))[None, :]       # (1, W)
    return jnp.concatenate([w1t, w2t, b1r, b2r], axis=0)             # (E+H+2, W)


def classifier_forward(x, params, *, H, C):
    """Single forward. x: (B, E) f32; params: packed slab from pack_params."""
    B, E = x.shape
    full = lambda shp: pl.BlockSpec(shp, lambda: (0,) * len(shp))
    return pl.pallas_call(
        _make_kernel(E, H, C),
        out_shape=jax.ShapeDtypeStruct((B, C), jnp.float32),
        grid=(),
        in_specs=[full((B, E)), full(params.shape)],
        out_specs=full((B, C)),
    )(x, params)


def classifier_forward_batched(xs, params, *, H, C):
    """N independent forwards in one launch. xs: (N, B, E) f32.

    Grid axis N is marked "parallel" so it shards across TensorCores on v7x.
    Each instance's (B, E) block stays whole, so softmax over dim=0 is exact.
    """
    N, B, E = xs.shape
    PR, PW = params.shape
    return pl.pallas_call(
        _make_kernel(E, H, C),
        out_shape=jax.ShapeDtypeStruct((N, B, C), jnp.float32),
        grid=(N,),
        in_specs=[
            pl.BlockSpec((pl.Squeezed(), B, E), lambda i: (i, 0, 0)),
            pl.BlockSpec((PR, PW), lambda i: (0, 0)),   # params reused every step
        ],
        out_specs=pl.BlockSpec((pl.Squeezed(), B, C), lambda i: (i, 0, 0)),
        compiler_params=pltpu.CompilerParams(
            dimension_semantics=("parallel",)),
    )(xs, params)
    # TODO(synk): if N grows large, consider a lane-dense (B, N*Cpad) output
    # layout for unmasked vst; at small N the masked (8,12) store is irrelevant.


def classifier_forward_ref(x, w1, b1, w2, b2):
    h = jax.nn.sigmoid(x @ w1.T + b1)
    logits = h @ w2.T + b2
    return jax.nn.softmax(logits, axis=0)


if __name__ == "__main__":
    # Small shapes consistent with the module: embedding_size=32, hidden=32,
    # cls_num=12, batch=8.
    B, E, H, C = 8, 32, 32, 12

    key = jax.random.PRNGKey(0)
    kx, kw1, kb1, kw2, kb2, kxs = jax.random.split(key, 6)

    x = jax.random.normal(kx, (B, E), dtype=jnp.float32)
    # Deterministic synthetic parameters (nn.Linear-like scale).
    w1 = jax.random.uniform(kw1, (H, E), minval=-1.0, maxval=1.0) / jnp.sqrt(E)
    b1 = jax.random.uniform(kb1, (H,), minval=-1.0, maxval=1.0) / jnp.sqrt(E)
    w2 = jax.random.uniform(kw2, (C, H), minval=-1.0, maxval=1.0) / jnp.sqrt(H)
    b2 = jax.random.uniform(kb2, (C,), minval=-1.0, maxval=1.0) / jnp.sqrt(H)

    # One-time parameter packing (lives at module-init time in practice).
    params = pack_params(w1, b1, w2, b2)

    # --- single-instance forward (module-equivalent) ---
    out = classifier_forward(x, params, H=H, C=C)
    out = jax.block_until_ready(out)
    ref = classifier_forward_ref(x, w1, b1, w2, b2)
    assert out.shape == (B, C)
    assert jnp.allclose(out, ref, atol=1e-5, rtol=1e-5), "single: mismatch vs JAX reference"

    # --- batched (throughput) path: N forwards, one launch ---
    N = 4
    xs = jax.random.normal(kxs, (N, B, E), dtype=jnp.float32)
    outs = classifier_forward_batched(xs, params, H=H, C=C)
    outs = jax.block_until_ready(outs)
    refs = jax.vmap(lambda xi: classifier_forward_ref(xi, w1, b1, w2, b2))(xs)
    assert outs.shape == (N, B, C)
    assert jnp.allclose(outs, refs, atol=1e-5, rtol=1e-5), "batched: mismatch vs JAX reference"

    print("KERNEL_OK")
</pallas_src>

<mosaic_0001>
module attributes {stable_mosaic.version = 11 : i64} {
  func.func @kernel(%arg0: memref<8x32xf32, #tpu.memory_space<vmem>>, %arg1: memref<66x32xf32, #tpu.memory_space<vmem>>, %arg2: memref<8x12xf32, #tpu.memory_space<vmem>>) attributes {dimension_semantics = [], scalar_prefetch = 0 : i64, scratch_operands = 0 : i64, tpu.core_type = #tpu.core_type<tc>} {
    %c0 = arith.constant 0 : index
    %c0_0 = arith.constant 0 : index
    %0 = vector.load %arg0[%c0, %c0_0] : memref<8x32xf32, #tpu.memory_space<vmem>>, vector<8x32xf32>
    %c0_1 = arith.constant 0 : index
    %c0_2 = arith.constant 0 : index
    %1 = vector.load %arg1[%c0_1, %c0_2] : memref<66x32xf32, #tpu.memory_space<vmem>>, vector<32x32xf32>
    %c32 = arith.constant 32 : index
    %c0_3 = arith.constant 0 : index
    %2 = vector.load %arg1[%c32, %c0_3] : memref<66x32xf32, #tpu.memory_space<vmem>>, vector<32x12xf32>
    %c64 = arith.constant 64 : index
    %c0_4 = arith.constant 0 : index
    %3 = vector.load %arg1[%c64, %c0_4] : memref<66x32xf32, #tpu.memory_space<vmem>>, vector<1x32xf32>
    %c65 = arith.constant 65 : index
    %c0_5 = arith.constant 0 : index
    %4 = vector.load %arg1[%c65, %c0_5] : memref<66x32xf32, #tpu.memory_space<vmem>>, vector<1x12xf32>
    %cst = arith.constant dense<0.000000e+00> : vector<8x32xf32>
    %5 = tpu.matmul %0, %1, %cst {dimension_numbers = #tpu.dot_dimension_numbers<[1], [0], [0], [1], [0, 0, 1, 1], [], []>} : vector<8x32xf32>, vector<32x32xf32>, vector<8x32xf32> -> vector<8x32xf32>
    %6 = vector.broadcast %3 : vector<1x32xf32> to vector<8x32xf32>
    %7 = arith.addf %5, %6 : vector<8x32xf32>
    %8 = arith.negf %7 : vector<8x32xf32>
    %9 = math.exp %8 : vector<8x32xf32>
    %cst_6 = arith.constant 1.000000e+00 : f32
    %10 = vector.broadcast %cst_6 : f32 to vector<8x32xf32>
    %11 = arith.addf %10, %9 : vector<8x32xf32>
    %12 = arith.divf %10, %11 : vector<8x32xf32>
    %cst_7 = arith.constant dense<0.000000e+00> : vector<8x12xf32>
    %13 = tpu.matmul %12, %2, %cst_7 {dimension_numbers = #tpu.dot_dimension_numbers<[1], [0], [0], [1], [0, 0, 1, 1], [], []>} : vector<8x32xf32>, vector<32x12xf32>, vector<8x12xf32> -> vector<8x12xf32>
    %14 = vector.broadcast %4 : vector<1x12xf32> to vector<8x12xf32>
    %15 = arith.addf %13, %14 : vector<8x12xf32>
    %cst_8 = arith.constant dense<0xFF800000> : vector<12xf32>
    %16 = vector.multi_reduction <maximumf>, %15, %cst_8 [0] : vector<8x12xf32> to vector<12xf32>
    %17 = vector.shape_cast %16 : vector<12xf32> to vector<1x12xf32>
    %18 = vector.broadcast %17 : vector<1x12xf32> to vector<8x12xf32>
    %19 = arith.subf %15, %18 : vector<8x12xf32>
    %20 = math.exp %19 : vector<8x12xf32>
    %cst_9 = arith.constant dense<0.000000e+00> : vector<12xf32>
    %21 = vector.multi_reduction <add>, %20, %cst_9 [0] : vector<8x12xf32> to vector<12xf32>
    %22 = vector.shape_cast %21 : vector<12xf32> to vector<1x12xf32>
    %23 = tpu.reciprocal %22 {approx = true} : vector<1x12xf32> -> vector<1x12xf32>
    %24 = arith.mulf %22, %23 : vector<1x12xf32>
    %cst_10 = arith.constant 2.000000e+00 : f32
    %25 = vector.broadcast %cst_10 : f32 to vector<1x12xf32>
    %26 = arith.subf %25, %24 : vector<1x12xf32>
    %27 = arith.mulf %23, %26 : vector<1x12xf32>
    %28 = vector.broadcast %27 : vector<1x12xf32> to vector<8x12xf32>
    %29 = arith.mulf %20, %28 : vector<8x12xf32>
    %c0_11 = arith.constant 0 : index
    %c0_12 = arith.constant 0 : index
    %30 = vector.load %arg2[%c0_11, %c0_12] : memref<8x12xf32, #tpu.memory_space<vmem>>, vector<8x12xf32>
    tpu.vector_store %arg2[%c0_11, %c0_12], %29 {strides = array<i32>} : memref<8x12xf32, #tpu.memory_space<vmem>>, vector<8x12xf32>,
    return
  }
}

</mosaic_0001>

<bundles_post_ra>
// kernel: tpu_custom_call.1
= control target key start
LH: loop header
LB: loop body
LE: loop exit
PB: predicated region body
PF: predicated region fallthrough
CT: control target
= control target key end

     0   :  { %s228_s0 = inlined_call_operand.vmem [shape: f32[8,32], index: 0, kind: input, shape index: {}]   ;;  %s229_s1 = inlined_call_operand.vmem [shape: f32[66,32], index: 1, kind: input, shape index: {}]   ;;  %s230_s2 = inlined_call_operand.hbm [shape: f32[8,12], index: 2, kind: output, shape index: {}]  }
   0x1   :  { %v16_v0 = vld [vmem:[%s229_s1 + $0x18] sm:$0xff]  ;;  %v15_v1 = vld [vmem:[%s229_s1 + $0x10] sm:$0xff]  ;;  %v14_v2 = vld [vmem:[%s229_s1 + $0x8] sm:$0xff] }
   0x2   :  { %40 = vmatpush.msra.mxu0 %v16_v0 }
   0x3   :  { %7 = vsyncpa [#allocation3], 0  ;;  %v13_v3 = vld [vmem:[%s229_s1] sm:$0xff]  ;;  %vm24_vm0 = vcmask 261120   ;;  %v20_v5 = vld [vmem:[%s229_s1 + $0x38] sm:$0xff]  ;;  %vm91_vm5 = vcmask 97280  }
   0x4   :  { %41 = vmatpush.msra.mxu0 %v15_v1  ;;  %v12_v4 = vld [vmem:[%s228_s0] sm:$0xff]  ;;  %v19_v6 = vld [vmem:[%s229_s1 + $0x30] sm:$0xff]  ;;  %83 = vmatpush.msra.mxu1 %v20_v5  ;;  %v18_v7 = vld [vmem:[%s229_s1 + $0x28] sm:$0xff]  ;;  %s122_s5 = sshll.u32 %s230_s2, 4  ;;  %s123_s5 = int_to_ptr.hbm [resolvable:$true] %s122_s5 }
   0x5   :  { %v17_v8 = vld [vmem:[%s229_s1 + $0x20] sm:$0xff] }
   0x6   :  { %42 = vmatpush.msra.mxu0 %v14_v2  ;;  %84 = vmatpush.msra.mxu1 %v19_v6  ;;  %v135_v9 = vld [vmem:[%s229_s1 + $0x40] ss:$0 sm:$0xff]  ;;  %v136_v25 = vld [vmem:[%s229_s1 + $0x41] ss:$0 sm:$0xff]  ;;  %s171_s1 = smov [#allocation2]  }
   0x7   :  { %s120_s30 = sshll.u32 %s171_s1, 4  ;;  %s121_s30 = int_to_ptr.vmem [resolvable:$true] %s120_s30 }
   0x8   :  { %43 = vmatpush.msra.mxu0 %v13_v3  ;;  %85 = vmatpush.msra.mxu1 %v18_v7 }
   0x9   :  { %131 = vmatmul.msk.f32.vlgmr.msra.gmra.mxu0 %vm24_vm0, %v12_v4 }
   0xa   :  { %86 = vmatpush.msra.mxu1 %v17_v8 }
  0x86   :  { %v45_v10 = vpop.f32.mrf.mxu0 }
  0x87   :  { %v46_v11 = vadd.f32 %v135_v9, %v45_v10 }
  0x89   :  { %v132_v12 = vmul.f32 -1.442695, %v46_v11 }
  0x8b   :  { %137 = vpow2.f32 %v132_v12 }
  0x91   :  { %v138_v13 = vpop.eup %137 }
  0x92   :  { %v51_v14 = vadd.f32 1.0, %v138_v13 }
  0x94   :  { %139 = vrcp.f32 %v51_v14  ;;  %v63_v18 = vand.u32 2147483648, %v51_v14  ;;  %v61_v20 = vand.u32 2147483647, %v51_v14  ;;  %vm57_vm2 = vweird.f32 %v51_v14 }
  0x96   :  { %v64_v22 = vor.u32 1.1754944e-38, %v63_v18  ;;  %vm62_vm4 = vcmp.eq.f32.partialorder %v61_v20, 8.507059e+37 }
  0x9a   :  { %v140_v15 = vpop.eup %139 }
  0x9b   :  { %v53_v16 = vmul.f32 %v140_v15, %v51_v14  ;;  %vm58_vm1 = vweird.f32 %v140_v15 }
  0x9c   :  { %vm59_vm3 = vmor %vm57_vm2, %vm58_vm1 }
  0x9d   :  { %v54_v17 = vsub.f32 1.0, %v53_v16 }
  0x9f   :  { %v55_v19 = vmul.f32 %v140_v15, %v54_v17 }
  0xa1   :  { %v56_v21 = vadd.f32 %v140_v15, %v55_v19 }
  0xa3   :  { %v60_v23 = vsel %vm59_vm3, %v140_v15, %v56_v21 }
  0xa4   :  { %v65_v24 = vsel %vm62_vm4, %v64_v22, %v60_v23 }
  0xa5   :  { %133 = vmatmul.msk.f32.vlgmr.msra.gmra.mxu1 %vm24_vm0, %v65_v24 }
 0x122   :  { %v88_v26 = vpop.f32.mrf.mxu1 }
 0x123   :  { %v89_v27 = vadd.f32 %v136_v25, %v88_v26 }
 0x125   :  { %v92_v28 = vsel %vm91_vm5, %v89_v27, -inf }
 0x126   :  { %v93_v29 = vrot.slane %v92_v28, 4 }
 0x128   :  { %v94_v30 = vmax.f32 %v92_v28, %v93_v29 }
 0x12a   :  { %v95_v31 = vrot.slane %v94_v30, 2 }
 0x12c   :  { %v96_v32 = vmax.f32 %v94_v30, %v95_v31 }
 0x12e   :  { %v97_v33 = vrot.slane %v96_v32, 1 }
 0x130   :  { %v98_v34 = vmax.f32 %v96_v32, %v97_v33 }
 0x132   :  { %v99_v35 = vsub.f32 %v89_v27, %v98_v34 }
 0x134   :  { %v100_v36 = vmul.f32 1.442695, %v99_v35 }
 0x136   :  { %141 = vpow2.f32 %v100_v36 }
 0x13c   :  { %v142_v37 = vpop.eup %141 }
 0x13d   :  { %v102_v38 = vsel %vm91_vm5, %v142_v37, 0.0 }
 0x13e   :  { %v103_v39 = vrot.slane %v102_v38, 4 }
 0x140   :  { %v104_v40 = vadd.f32 %v103_v39, %v102_v38 }
 0x142   :  { %v105_v41 = vrot.slane %v104_v40, 2 }
 0x144   :  { %v106_v42 = vadd.f32 %v105_v41, %v104_v40 }
 0x146   :  { %v107_v43 = vrot.slane %v106_v42, 1 }
 0x148   :  { %v108_v44 = vadd.f32 %v107_v43, %v106_v42 }
 0x14a   :  { %143 = vrcp.f32 %v108_v44 }
 0x150   :  { %v144_v45 = vpop.eup %143 }
 0x151   :  { %v110_v46 = vmul.f32 %v144_v45, %v108_v44 }
 0x153   :  { %v111_v47 = vsub.f32 2.0, %v110_v46 }
 0x155   :  { %v112_v48 = vmul.f32 %v144_v45, %v111_v47 }
 0x157   :  { %v113_v49 = vmul.f32 %v142_v37, %v112_v48 }
 0x159   :  { %114 = vst.msk [vmem:[#allocation2] sm:$0xff] %vm91_vm5, %v113_v49 }
 0x15a   :  { %125 = dma.vmem_to_hbm [thread:$0]  %s121_s30, 128, %s123_s5, [#allocation3]  }
 0x15b   :  { %169 = dma.done.wait [#allocation3], 128  }
 0x15c   :  { %170 = vsyncadd [#allocation3], 4294967168 }
 0x15d   :  { %130 = vsyncpa [#allocation3], 1 }

</bundles_post_ra>
